<compile_context>
chip_gen: v7x
topology: tpu7x:2x2x1
jax: 0.10.0
libtpu: 0.0.40
codegen_flags: <defaults>
</compile_context>

<pallas_src>
import functools

import jax
import jax.numpy as jnp
from jax.experimental import pallas as pl
from jax.experimental.pallas import tpu as pltpu

BN_EPS = 1e-5
_STATS_ROWS = 8  # sublane-padded; row 0 = column sum, row 1 = column sum-of-sq


def _round_up(x, m):
    return (x + m - 1) // m * m


def _matmul_stats_kernel(x_ref, w_ref, y_ref, stats_ref):
    """Phase 1: y = x @ W (bf16 MXU, f32 acc) + accumulate BN column stats.

    x_ref     : (1, TN, D_in)     bf16 row tile of one slab
    w_ref     : (1, D_in, D_pad)  bf16 slab weight (resident across row tiles)
    y_ref     : (1, TN, D_pad)    f32 projected tile (written back to HBM)
    stats_ref : (1, 8, D_pad)     f32 accumulator, revisited across row tiles
    """
    ti = pl.program_id(1)

    @pl.when(ti == 0)
    def _init():
        stats_ref[...] = jnp.zeros_like(stats_ref)

    # Linear (no bias: BN mean subtraction cancels it exactly).
    y = jnp.dot(x_ref[0], w_ref[0], preferred_element_type=jnp.float32)
    y_ref[0] = y

    # One-pass sum / sum-of-squares in f32.  Padded (all-zero) rows contribute
    # 0 to both sums; the true row count is applied in the wrapper.  For a
    # Linear on roughly-normalized features mu^2 << E[y^2], so the one-pass
    # variance is numerically safe in f32 (fallback: 3-sweep two-pass).
    stats_ref[0, 0:1, :] += jnp.sum(y, axis=0, keepdims=True)
    stats_ref[0, 1:2, :] += jnp.sum(y * y, axis=0, keepdims=True)


def _normalize_kernel(y_ref, scale_ref, shift_ref, o_ref):
    """Phase 2: lane-dense elementwise affine out = y * scale + shift."""
    o_ref[0] = y_ref[0] * scale_ref[0] + shift_ref[0]


@functools.partial(jax.jit, static_argnames=("tn",))
def fused_linear_bn(x_stack, w_stack, gamma, beta, counts, *, tn):
    """Fused Linear + BatchNorm1d (training-mode stats) over stacked slabs.

    x_stack : (S, N_pad, D_in)   bf16
    w_stack : (S, D_in, D_pad)   bf16
    gamma   : (S, 1, D_pad)      f32
    beta    : (S, 1, D_pad)      f32
    counts  : (S,)               f32  true (unpadded) row count per slab
    returns : (S, N_pad, D_pad)  f32
    """
    s, n_pad, d_in = x_stack.shape
    d_pad = w_stack.shape[2]
    n_tiles = n_pad // tn

    y, stats = pl.pallas_call(
        _matmul_stats_kernel,
        out_shape=(
            jax.ShapeDtypeStruct((s, n_pad, d_pad), jnp.float32),
            jax.ShapeDtypeStruct((s, _STATS_ROWS, d_pad), jnp.float32),
        ),
        grid=(s, n_tiles),
        in_specs=[
            pl.BlockSpec((1, tn, d_in), lambda si, ti: (si, ti, 0)),
            pl.BlockSpec((1, d_in, d_pad), lambda si, ti: (si, 0, 0)),
        ],
        out_specs=(
            pl.BlockSpec((1, tn, d_pad), lambda si, ti: (si, ti, 0)),
            pl.BlockSpec((1, _STATS_ROWS, d_pad), lambda si, ti: (si, 0, 0)),
        ),
        compiler_params=pltpu.CompilerParams(
            dimension_semantics=("parallel", "arbitrary")),
    )(x_stack, w_stack)

    # Tiny per-slab affine-parameter computation in plain XLA (f32).
    n = counts[:, None, None]
    mu = stats[:, 0:1, :] / n
    var = jnp.maximum(stats[:, 1:2, :] / n - mu * mu, 0.0)
    inv_std = jax.lax.rsqrt(var + BN_EPS)
    scale = gamma * inv_std
    shift = beta - mu * scale

    return pl.pallas_call(
        _normalize_kernel,
        out_shape=jax.ShapeDtypeStruct((s, n_pad, d_pad), jnp.float32),
        grid=(s, n_tiles),
        in_specs=[
            pl.BlockSpec((1, tn, d_pad), lambda si, ti: (si, ti, 0)),
            pl.BlockSpec((1, 1, d_pad), lambda si, ti: (si, 0, 0)),
            pl.BlockSpec((1, 1, d_pad), lambda si, ti: (si, 0, 0)),
        ],
        out_specs=pl.BlockSpec((1, tn, d_pad), lambda si, ti: (si, ti, 0)),
        compiler_params=pltpu.CompilerParams(
            dimension_semantics=("parallel", "parallel")),
    )(y, scale, shift)


class FeatureEncoderPallas:
    """JAX/Pallas equivalent of H2GB FeatureEncoder (homogeneous-graph path).

    node_encoder    : Linear(node_dim_in -> dim_inner)
    node_encoder_bn : BatchNorm1d(dim_inner), training mode
    edge_encoder    : Linear(edge_dim_in -> dim_edge), dim_edge == dim_inner
    edge_encoder_bn : BatchNorm1d(dim_edge), training mode
    """

    def __init__(self, node_dim_in, edge_dim_in, dim_inner, key):
        k1, k2, k3, k4 = jax.random.split(key, 4)
        self.dim_inner = dim_inner
        dim_edge = dim_inner  # non-PNA branch of the config

        def linear_init(k, fan_in, fan_out):
            bound = 1.0 / jnp.sqrt(fan_in)
            kw, kb = jax.random.split(k)
            w = jax.random.uniform(kw, (fan_in, fan_out), jnp.float32,
                                   -bound, bound)
            b = jax.random.uniform(kb, (1, fan_out), jnp.float32,
                                   -bound, bound)
            return w, b

        # Biases are kept as module parameters (original semantics) but never
        # shipped to the kernel: training-mode BN cancels them exactly.
        self.node_w, self.node_b = linear_init(k1, node_dim_in, dim_inner)
        self.edge_w, self.edge_b = linear_init(k2, edge_dim_in, dim_edge)
        self.node_gamma = 1.0 + 0.01 * jax.random.normal(k3, (1, dim_inner))
        self.node_beta = jnp.zeros((1, dim_inner), jnp.float32)
        self.edge_gamma = 1.0 + 0.01 * jax.random.normal(k4, (1, dim_edge))
        self.edge_beta = jnp.zeros((1, dim_edge), jnp.float32)

    def __call__(self, batch):
        """batch: dict with 'x' (N, node_dim_in) and 'edge_attr' (E, edge_dim_in)."""
        x, e = batch["x"], batch["edge_attr"]
        n_n, n_e = x.shape[0], e.shape[0]
        d_in = max(x.shape[1], e.shape[1])
        d_out = self.dim_inner
        d_pad = _round_up(d_out, 128)          # lane-dense output columns

        max_n = max(n_n, n_e)
        tn = 512 if max_n >= 512 else _round_up(max_n, 8)
        n_pad = _round_up(max_n, tn)

        def pad2(a, rows, cols, val=0.0):
            return jnp.pad(
                a, ((0, rows - a.shape[0]), (0, cols - a.shape[1])),
                constant_values=val)

        # Zero padding is exact: padded x columns hit zero W rows, padded
        # (all-zero) rows contribute nothing to the BN sums.
        x_stack = jnp.stack(
            [pad2(x, n_pad, d_in), pad2(e, n_pad, d_in)]).astype(jnp.bfloat16)
        w_stack = jnp.stack(
            [pad2(self.node_w, d_in, d_pad),
             pad2(self.edge_w, d_in, d_pad)]).astype(jnp.bfloat16)
        gamma = jnp.stack([pad2(self.node_gamma, 1, d_pad, 1.0),
                           pad2(self.edge_gamma, 1, d_pad, 1.0)])
        beta = jnp.stack([pad2(self.node_beta, 1, d_pad),
                          pad2(self.edge_beta, 1, d_pad)])
        counts = jnp.array([n_n, n_e], jnp.float32)

        y = fused_linear_bn(x_stack, w_stack, gamma, beta, counts, tn=tn)

        out = dict(batch)
        out["x"] = y[0, :n_n, :d_out]
        out["edge_attr"] = y[1, :n_e, :d_out]
        return out
        # TODO(synk): hetero (per-node-type HeteroData) dict path of
        # FeatureEncoder would stack one slab per node/edge type through the
        # same fused kernel; omitted here.


def _reference(batch, enc):
    """Pure-JAX reference: Linear (WITH bias) + training-mode BatchNorm1d.

    Matmul inputs are rounded to bf16 to mirror the kernel's MXU input
    precision (bf16 products are exact in the f32 accumulator); the bias IS
    applied here, demonstrating that dropping it in the kernel is exact up to
    fp rounding because BN mean subtraction cancels it.
    """
    def lin_bn(x, w, b, g, be):
        xb = x.astype(jnp.bfloat16).astype(jnp.float32)
        wb = w.astype(jnp.bfloat16).astype(jnp.float32)
        y = jnp.dot(xb, wb, precision=jax.lax.Precision.HIGHEST) + b
        mu = y.mean(0, keepdims=True)
        var = ((y - mu) ** 2).mean(0, keepdims=True)
        return g * (y - mu) / jnp.sqrt(var + BN_EPS) + be

    return {
        "x": lin_bn(batch["x"], enc.node_w, enc.node_b,
                    enc.node_gamma, enc.node_beta),
        "edge_attr": lin_bn(batch["edge_attr"], enc.edge_w, enc.edge_b,
                            enc.edge_gamma, enc.edge_beta),
    }


if __name__ == "__main__":
    key = jax.random.PRNGKey(0)
    k_in, k_params = jax.random.split(key)
    kx, ke = jax.random.split(k_in)

    num_nodes, node_dim_in = 64, 32
    num_edges, edge_dim_in = 128, 16
    dim_inner = 32

    batch = {
        "x": jax.random.normal(kx, (num_nodes, node_dim_in), jnp.float32),
        "edge_attr": jax.random.normal(ke, (num_edges, edge_dim_in),
                                       jnp.float32),
    }

    encoder = FeatureEncoderPallas(node_dim_in, edge_dim_in, dim_inner,
                                   k_params)

    out = encoder(batch)
    jax.block_until_ready(out["x"])
    jax.block_until_ready(out["edge_attr"])

    ref = _reference(batch, encoder)
    assert out["x"].shape == (num_nodes, dim_inner)
    assert out["edge_attr"].shape == (num_edges, dim_inner)
    assert jnp.allclose(out["x"], ref["x"], atol=2e-3, rtol=2e-3)
    assert jnp.allclose(out["edge_attr"], ref["edge_attr"], atol=2e-3,
                        rtol=2e-3)

    print("KERNEL_OK")
</pallas_src>

<mosaic_0001>
module attributes {stable_mosaic.version = 11 : i64} {
  func.func @_normalize_kernel(%arg0: i32, %arg1: i32, %arg2: memref<1x128x128xf32, #tpu.memory_space<vmem>>, %arg3: memref<1x1x128xf32, #tpu.memory_space<vmem>>, %arg4: memref<1x1x128xf32, #tpu.memory_space<vmem>>, %arg5: memref<1x128x128xf32, #tpu.memory_space<vmem>>) attributes {dimension_semantics = [#tpu.dimension_semantics<parallel>, #tpu.dimension_semantics<parallel>], iteration_bounds = array<i64: 2, 1>, scalar_prefetch = 0 : i64, scratch_operands = 0 : i64, tpu.core_type = #tpu.core_type<tc>, window_params = [{transform_indices = @transform_0, window_bounds = array<i64: 1, 128, 128>}, {transform_indices = @transform_1, window_bounds = array<i64: 1, 1, 128>}, {transform_indices = @transform_2, window_bounds = array<i64: 1, 1, 128>}, {transform_indices = @transform_3, window_bounds = array<i64: 1, 128, 128>}]} {
    %c0 = arith.constant 0 : index
    %c0_0 = arith.constant 0 : index
    %c0_1 = arith.constant 0 : index
    %0 = vector.load %arg2[%c0, %c0_0, %c0_1] : memref<1x128x128xf32, #tpu.memory_space<vmem>>, vector<1x128x128xf32>
    %1 = vector.shape_cast %0 : vector<1x128x128xf32> to vector<128x128xf32>
    %c0_2 = arith.constant 0 : index
    %c0_3 = arith.constant 0 : index
    %c0_4 = arith.constant 0 : index
    %2 = vector.load %arg3[%c0_2, %c0_3, %c0_4] : memref<1x1x128xf32, #tpu.memory_space<vmem>>, vector<1x1x128xf32>
    %3 = vector.shape_cast %2 : vector<1x1x128xf32> to vector<1x128xf32>
    %4 = vector.broadcast %3 : vector<1x128xf32> to vector<128x128xf32>
    %5 = arith.mulf %1, %4 : vector<128x128xf32>
    %c0_5 = arith.constant 0 : index
    %c0_6 = arith.constant 0 : index
    %c0_7 = arith.constant 0 : index
    %6 = vector.load %arg4[%c0_5, %c0_6, %c0_7] : memref<1x1x128xf32, #tpu.memory_space<vmem>>, vector<1x1x128xf32>
    %7 = vector.shape_cast %6 : vector<1x1x128xf32> to vector<1x128xf32>
    %8 = vector.broadcast %7 : vector<1x128xf32> to vector<128x128xf32>
    %9 = arith.addf %5, %8 : vector<128x128xf32>
    %c0_8 = arith.constant 0 : index
    %c0_9 = arith.constant 0 : index
    %c0_10 = arith.constant 0 : index
    %10 = vector.load %arg5[%c0_8, %c0_9, %c0_10] : memref<1x128x128xf32, #tpu.memory_space<vmem>>, vector<1x128x128xf32>
    %11 = vector.shape_cast %10 : vector<1x128x128xf32> to vector<128x128xf32>
    %12 = vector.shape_cast %9 : vector<128x128xf32> to vector<1x128x128xf32>
    tpu.vector_store %arg5[%c0_8, %c0_9, %c0_10], %12 {strides = array<i32>} : memref<1x128x128xf32, #tpu.memory_space<vmem>>, vector<1x128x128xf32>,
    return
  }
  func.func @transform_0(%arg0: i32, %arg1: i32) -> (i32, i32, i32) {
    %c0_i32 = arith.constant 0 : i32
    %c0_i32_0 = arith.constant 0 : i32
    return %arg0, %arg1, %c0_i32 : i32, i32, i32
  }
  func.func @transform_1(%arg0: i32, %arg1: i32) -> (i32, i32, i32) {
    %c0_i32 = arith.constant 0 : i32
    %c0_i32_0 = arith.constant 0 : i32
    %c0_i32_1 = arith.constant 0 : i32
    return %arg0, %c0_i32, %c0_i32_0 : i32, i32, i32
  }
  func.func @transform_2(%arg0: i32, %arg1: i32) -> (i32, i32, i32) {
    %c0_i32 = arith.constant 0 : i32
    %c0_i32_0 = arith.constant 0 : i32
    %c0_i32_1 = arith.constant 0 : i32
    return %arg0, %c0_i32, %c0_i32_0 : i32, i32, i32
  }
  func.func @transform_3(%arg0: i32, %arg1: i32) -> (i32, i32, i32) {
    %c0_i32 = arith.constant 0 : i32
    %c0_i32_0 = arith.constant 0 : i32
    return %arg0, %arg1, %c0_i32 : i32, i32, i32
  }
}

module attributes {stable_mosaic.version = 11 : i64} {
  func.func @_matmul_stats_kernel(%arg0: i32, %arg1: i32, %arg2: memref<1x128x32xbf16, #tpu.memory_space<vmem>>, %arg3: memref<1x32x128xbf16, #tpu.memory_space<vmem>>, %arg4: memref<1x128x128xf32, #tpu.memory_space<vmem>>, %arg5: memref<1x8x128xf32, #tpu.memory_space<vmem>>) attributes {dimension_semantics = [#tpu.dimension_semantics<parallel>, #tpu.dimension_semantics<arbitrary>], iteration_bounds = array<i64: 2, 1>, scalar_prefetch = 0 : i64, scratch_operands = 0 : i64, tpu.core_type = #tpu.core_type<tc>, window_params = [{transform_indices = @transform_0, window_bounds = array<i64: 1, 128, 32>}, {transform_indices = @transform_1, window_bounds = array<i64: 1, 32, 128>}, {transform_indices = @transform_2, window_bounds = array<i64: 1, 128, 128>}, {transform_indices = @transform_3, window_bounds = array<i64: 1, 8, 128>}]} {
    %c0_i32 = arith.constant 0 : i32
    %0 = arith.cmpi eq, %arg1, %c0_i32 : i32
    %1 = arith.extui %0 : i1 to i32
    %c0_i32_0 = arith.constant 0 : i32
    %2 = arith.cmpi ne, %1, %c0_i32_0 : i32
    scf.if %2 {
      %cst_22 = arith.constant 0.000000e+00 : f32
      %28 = vector.broadcast %cst_22 : f32 to vector<1x8x128xf32>
      %c0_23 = arith.constant 0 : index
      %c0_24 = arith.constant 0 : index
      %c0_25 = arith.constant 0 : index
      %29 = vector.load %arg5[%c0_23, %c0_24, %c0_25] : memref<1x8x128xf32, #tpu.memory_space<vmem>>, vector<1x8x128xf32>
      tpu.vector_store %arg5[%c0_23, %c0_24, %c0_25], %28 {strides = array<i32>} : memref<1x8x128xf32, #tpu.memory_space<vmem>>, vector<1x8x128xf32>,
    } else {
    }
    %c0 = arith.constant 0 : index
    %c0_1 = arith.constant 0 : index
    %c0_2 = arith.constant 0 : index
    %3 = vector.load %arg2[%c0, %c0_1, %c0_2] : memref<1x128x32xbf16, #tpu.memory_space<vmem>>, vector<1x128x32xbf16>
    %4 = vector.shape_cast %3 : vector<1x128x32xbf16> to vector<128x32xbf16>
    %c0_3 = arith.constant 0 : index
    %c0_4 = arith.constant 0 : index
    %c0_5 = arith.constant 0 : index
    %5 = vector.load %arg3[%c0_3, %c0_4, %c0_5] : memref<1x32x128xbf16, #tpu.memory_space<vmem>>, vector<1x32x128xbf16>
    %6 = vector.shape_cast %5 : vector<1x32x128xbf16> to vector<32x128xbf16>
    %cst = arith.constant dense<0.000000e+00> : vector<128x128xf32>
    %7 = tpu.matmul %4, %6, %cst {dimension_numbers = #tpu.dot_dimension_numbers<[1], [0], [0], [1], [0, 0, 1, 1], [], []>} : vector<128x32xbf16>, vector<32x128xbf16>, vector<128x128xf32> -> vector<128x128xf32>
    %c0_6 = arith.constant 0 : index
    %c0_7 = arith.constant 0 : index
    %c0_8 = arith.constant 0 : index
    %8 = vector.load %arg4[%c0_6, %c0_7, %c0_8] : memref<1x128x128xf32, #tpu.memory_space<vmem>>, vector<1x128x128xf32>
    %9 = vector.shape_cast %8 : vector<1x128x128xf32> to vector<128x128xf32>
    %10 = vector.shape_cast %7 : vector<128x128xf32> to vector<1x128x128xf32>
    tpu.vector_store %arg4[%c0_6, %c0_7, %c0_8], %10 {strides = array<i32>} : memref<1x128x128xf32, #tpu.memory_space<vmem>>, vector<1x128x128xf32>,
    %c0_9 = arith.constant 0 : index
    %c0_10 = arith.constant 0 : index
    %c0_11 = arith.constant 0 : index
    %11 = vector.load %arg5[%c0_9, %c0_10, %c0_11] : memref<1x8x128xf32, #tpu.memory_space<vmem>>, vector<1x1x128xf32>
    %12 = vector.shape_cast %11 : vector<1x1x128xf32> to vector<1x128xf32>
    %cst_12 = arith.constant dense<0.000000e+00> : vector<128xf32>
    %13 = vector.multi_reduction <add>, %7, %cst_12 [0] : vector<128x128xf32> to vector<128xf32>
    %14 = vector.shape_cast %13 : vector<128xf32> to vector<1x128xf32>
    %15 = arith.addf %12, %14 : vector<1x128xf32>
    %c0_13 = arith.constant 0 : index
    %c0_14 = arith.constant 0 : index
    %c0_15 = arith.constant 0 : index
    %16 = vector.load %arg5[%c0_13, %c0_14, %c0_15] : memref<1x8x128xf32, #tpu.memory_space<vmem>>, vector<1x1x128xf32>
    %17 = vector.shape_cast %16 : vector<1x1x128xf32> to vector<1x128xf32>
    %18 = vector.shape_cast %15 : vector<1x128xf32> to vector<1x1x128xf32>
    tpu.vector_store %arg5[%c0_13, %c0_14, %c0_15], %18 {strides = array<i32>} : memref<1x8x128xf32, #tpu.memory_space<vmem>>, vector<1x1x128xf32>,
    %c0_16 = arith.constant 0 : index
    %c1 = arith.constant 1 : index
    %c0_17 = arith.constant 0 : index
    %19 = vector.load %arg5[%c0_16, %c1, %c0_17] : memref<1x8x128xf32, #tpu.memory_space<vmem>>, vector<1x1x128xf32>
    %20 = vector.shape_cast %19 : vector<1x1x128xf32> to vector<1x128xf32>
    %21 = arith.mulf %7, %7 : vector<128x128xf32>
    %cst_18 = arith.constant dense<0.000000e+00> : vector<128xf32>
    %22 = vector.multi_reduction <add>, %21, %cst_18 [0] : vector<128x128xf32> to vector<128xf32>
    %23 = vector.shape_cast %22 : vector<128xf32> to vector<1x128xf32>
    %24 = arith.addf %20, %23 : vector<1x128xf32>
    %c0_19 = arith.constant 0 : index
    %c1_20 = arith.constant 1 : index
    %c0_21 = arith.constant 0 : index
    %25 = vector.load %arg5[%c0_19, %c1_20, %c0_21] : memref<1x8x128xf32, #tpu.memory_space<vmem>>, vector<1x1x128xf32>
    %26 = vector.shape_cast %25 : vector<1x1x128xf32> to vector<1x128xf32>
    %27 = vector.shape_cast %24 : vector<1x128xf32> to vector<1x1x128xf32>
    tpu.vector_store %arg5[%c0_19, %c1_20, %c0_21], %27 {strides = array<i32>} : memref<1x8x128xf32, #tpu.memory_space<vmem>>, vector<1x1x128xf32>,
    return
  }
  func.func @transform_0(%arg0: i32, %arg1: i32) -> (i32, i32, i32) {
    %c0_i32 = arith.constant 0 : i32
    %c0_i32_0 = arith.constant 0 : i32
    return %arg0, %arg1, %c0_i32 : i32, i32, i32
  }
  func.func @transform_1(%arg0: i32, %arg1: i32) -> (i32, i32, i32) {
    %c0_i32 = arith.constant 0 : i32
    %c0_i32_0 = arith.constant 0 : i32
    %c0_i32_1 = arith.constant 0 : i32
    return %arg0, %c0_i32, %c0_i32_0 : i32, i32, i32
  }
  func.func @transform_2(%arg0: i32, %arg1: i32) -> (i32, i32, i32) {
    %c0_i32 = arith.constant 0 : i32
    %c0_i32_0 = arith.constant 0 : i32
    return %arg0, %arg1, %c0_i32 : i32, i32, i32
  }
  func.func @transform_3(%arg0: i32, %arg1: i32) -> (i32, i32, i32) {
    %c0_i32 = arith.constant 0 : i32
    %c0_i32_0 = arith.constant 0 : i32
    %c0_i32_1 = arith.constant 0 : i32
    return %arg0, %c0_i32, %c0_i32_0 : i32, i32, i32
  }
}

</mosaic_0001>

<bundles_post_ra>
// kernel: fused_linear_bn.3
= control target key start
LH: loop header
LB: loop body
LE: loop exit
PB: predicated region body
PF: predicated region fallthrough
CT: control target
= control target key end

     0   :  { %8 = vsyncpa [#allocation3], 0  ;;  %s779_s0 = inlined_call_operand.vmem [shape: f32[2,128,128], index: 0, kind: input, shape index: {}]   ;;  %s780_s1 = inlined_call_operand.vmem [shape: f32[2,1,128], index: 1, kind: input, shape index: {}]   ;;  %s781_s2 = inlined_call_operand.vmem [shape: f32[2,1,128], index: 2, kind: input, shape index: {}]   ;;  %s782_s3 = inlined_call_operand.hbm [shape: f32[2,128,128], index: 3, kind: output, shape index: {}]  }
   0x1   :  { %10 = vsyncpa [#allocation3 + $0x1], 0  ;;  %s596_s12 = smov 0   ;;  %s598_s13 = smov 0  }
   0x2   :  { %s600_s14 = smov 0   ;;  %s602_s15 = smov 0  }
   0x3   :  { %s604_s16 = smov 0   ;;  %s606_s17 = smov 0  }
   0x4 LB: > { %s419_s18 = sadd.s32 4294967295, %s571_s17   ;;  %s420_s19 = sadd.s32 4294967294, %s571_s17   ;;  %s571_s17 = sphi %s606_s17, %s16_s17   ;;  %s567_s16 = sphi %s604_s16, %s789_s16   ;;  %s563_s15 = sphi %s602_s15, %s788_s15   ;;  %s559_s14 = sphi %s600_s14, %s787_s14   ;;  %s555_s13 = sphi %s598_s13, %s786_s13   ;;  %s551_s12 = sphi %s596_s12, %s785_s12  }
   0x5   : > { %s28_s20 = sadd.s32 1, %s567_s16  ;;  %s117_s21 = sadd.s32 1, %s559_s14 }
   0x6   : > { %p30_p0 = scmp.ge.s32.totalorder %s28_s20, 2  ;;  %p127_p1 = scmp.ne.s32.totalorder %s559_s14, %s555_s13 }
   0x7   : > { %p128_p2 = scmp.eq.s32.totalorder %s419_s18, 1  ;;  %p133_p3 = scmp.ne.s32.totalorder %s555_s13, %s551_s12 }
   0x8   : > { %s791_s20 = smov (%p30_p0, %s28_s20), 0  ;;  %p134_p5 = scmp.eq.s32.totalorder %s420_s19, 1 }
   0x9   : > { %p636_p4 = por %p128_p2, %p127_p1  ;;  %s112_s23 = ssub.s32 %s567_s16, %s791_s20 }
   0xa   : > { %p423_p6 = scmp.ge.s32.totalorder %s571_s17, 1  ;;  %p115_p7 = scmp.eq.s32.totalorder %s112_s23, 0 }
   0xb   : > { %p643_p8 = por %p134_p5, %p133_p3  ;;  %p177_p9 = scmp.lt.s32.totalorder %s571_s17, 3 }
   0xc   : > { %s649_s25 = scalar_select %p115_p7, %s559_s14, %s117_s21  }
   0xd   : > { %p178_p10 = pnand %p423_p6, %p177_p9 }
   0xe   : > { %p212_p11 = scmp.lt.s32.totalorder (!%p178_p10), %s563_s15, 1  ;;  %s208_s26 = sand.u32 (!%p178_p10), 1, %s555_s13  }
   0xf   : > { %181 = sbr.rel (%p178_p10) target bundleno = 54 (0x36), region = 32  ;;  %s656_s28 = sshll.u32 (!%p178_p10), %s208_s26, 7 }
  0x10   : > { %s691_s18 = scalar_lea.vmem (!%p178_p10), [#allocation2], %s656_s28  ;;  %s435_s19 = sshll.u32 (!%p178_p10), %s563_s15, 11 }
  0x11   : > { %s322_s21 = sshll.u32 (!%p178_p10), %s691_s18, 4  ;;  %s733_s28 = scalar_lea.sflag (!%p178_p10), [#allocation3], %s208_s26  ;;  %s722_s21 = int_to_ptr.vmem [resolvable:$true] %s322_s21 }
  0x12   : > { %s573_s30 = smov (!%p178_p10), [#allocation2]  }
  0x13   : > { %s497_s4 = sshll.u32 (!%p178_p10), %s573_s30, 4  ;;  %s498_s4 = int_to_ptr.vmem [resolvable:$false] %s497_s4 }
  0x14   : > { %p500_p1 = scmp.lt.s32.totalorder (!%p178_p10), %s722_s21, %s498_s4 }
  0x16   : > { %s213_s27 = scalar_select %p212_p11, %s563_s15, 1 }
  0x18   : > { %s434_s29 = sshll.u32 %s213_s27, 7  ;;  %s223_s5 = scalar_lea.vmem %s780_s1, %s213_s27 }
  0x19   : > { %s664_s8 = scalar_lea.vmem %s779_s0, %s434_s29  ;;  %s226_s11 = scalar_lea.vmem %s781_s2, %s213_s27  ;;  %v427_v0 = vld [vmem:[%s223_s5] ss:$0 sm:$0xff] }
  0x1a   : > { %v228_v1 = vld [vmem:[%s664_s8] sm:$0xff]  ;;  %v229_v3 = vld [vmem:[%s664_s8 + $0x8] sm:$0xff]  ;;  %v230_v6 = vld [vmem:[%s664_s8 + $0x10] sm:$0xff]  ;;  %s720_s27 = scalar_lea.hbm %s782_s3, %s435_s19  ;;  %s493_s29 = scalar_lea.vmem %s722_s21, 2048 }
  0x1b   : > { %v670_v2 = vld [vmem:[%s226_s11] ss:$0 sm:$0xff]  ;;  %v251_v4 = vmul.f32 %v427_v0, %v228_v1  ;;  %v252_v5 = vmul.f32 %v427_v0, %v229_v3  ;;  %v231_v7 = vld [vmem:[%s664_s8 + $0x18] sm:$0xff]  ;;  %v253_v9 = vmul.f32 %v427_v0, %v230_v6  ;;  %v233_v12 = vld [vmem:[%s664_s8 + $0x28] sm:$0xff]  ;;  %p494_p12 = scmp.ne.s32.totalorder %s722_s21, %s493_s29  ;;  %s499_s5 = scalar_lea.vmem %s498_s4, 4096 }
  0x1c   : > { %v232_v8 = vld [vmem:[%s664_s8 + $0x20] sm:$0xff]  ;;  %v254_v10 = vmul.f32 %v427_v0, %v231_v7  ;;  %v234_v13 = vld [vmem:[%s664_s8 + $0x30] sm:$0xff]  ;;  %v235_v14 = vld [vmem:[%s664_s8 + $0x38] sm:$0xff]  ;;  %v256_v17 = vmul.f32 %v427_v0, %v233_v12  ;;  %p501_p2 = scmp.lt.s32.totalorder %s499_s5, %s493_s29 }
  0x1d   : > { %v255_v11 = vmul.f32 %v427_v0, %v232_v8  ;;  %v274_v15 = vadd.f32 %v670_v2, %v251_v4  ;;  %v275_v16 = vadd.f32 %v670_v2, %v252_v5  ;;  %v257_v18 = vmul.f32 %v427_v0, %v234_v13  ;;  %v236_v19 = vld [vmem:[%s664_s8 + $0x40] sm:$0xff]  ;;  %v237_v20 = vld [vmem:[%s664_s8 + $0x48] sm:$0xff]  ;;  %v238_v21 = vld [vmem:[%s664_s8 + $0x50] sm:$0xff]  ;;  %p495_p13 = pnand %p494_p12, %p636_p4 }
  0x1e   : > { %v276_v22 = vadd.f32 %v670_v2, %v253_v9  ;;  %v277_v23 = vadd.f32 %v670_v2, %v254_v10  ;;  %v258_v25 = vmul.f32 %v427_v0, %v235_v14  ;;  %v239_v26 = vld [vmem:[%s664_s8 + $0x58] sm:$0xff]  ;;  %v240_v27 = vld [vmem:[%s664_s8 + $0x60] sm:$0xff]  ;;  %v241_v28 = vld [vmem:[%s664_s8 + $0x68] sm:$0xff]  ;;  %v279_v29 = vadd.f32 %v670_v2, %v256_v17  ;;  %p502_p3 = por %p501_p2, %p500_p1 }
  0x1f   : > { %v278_v24 = vadd.f32 %v670_v2, %v255_v11  ;;  %290 = vst [vmem:[%s691_s18] sm:$0xff] %v274_v15  ;;  %291 = vst [vmem:[%s691_s18 + $0x8] sm:$0xff] %v275_v16  ;;  %v280_v30 = vadd.f32 %v670_v2, %v257_v18  ;;  %v259_v31 = vmul.f32 %v427_v0, %v236_v19  ;;  %v242_v33 = vld [vmem:[%s664_s8 + $0x70] sm:$0xff]  ;;  %v243_v34 = vld [vmem:[%s664_s8 + $0x78] sm:$0xff]  ;;  %p496_p0 = pneg %p495_p13 }
  0x20   : > { %v260_v32 = vmul.f32 %v427_v0, %v237_v20  ;;  %292 = vst [vmem:[%s691_s18 + $0x10] sm:$0xff] %v276_v22  ;;  %293 = vst [vmem:[%s691_s18 + $0x18] sm:$0xff] %v277_v23  ;;  %v281_v35 = vadd.f32 %v670_v2, %v258_v25  ;;  %v261_v36 = vmul.f32 %v427_v0, %v238_v21 }
  0x21   : > { %294 = vst [vmem:[%s691_s18 + $0x20] sm:$0xff] %v278_v24  ;;  %v262_v37 = vmul.f32 %v427_v0, %v239_v26  ;;  %v263_v38 = vmul.f32 %v427_v0, %v240_v27  ;;  %295 = vst [vmem:[%s691_s18 + $0x28] sm:$0xff] %v279_v29  ;;  %v282_v39 = vadd.f32 %v670_v2, %v259_v31  ;;  %p503_p5 = pnand %p502_p3, %p496_p0 }
  0x22   : > { %296 = vst [vmem:[%s691_s18 + $0x30] sm:$0xff] %v280_v30  ;;  %v283_v40 = vadd.f32 %v670_v2, %v260_v32  ;;  %v264_v41 = vmul.f32 %v427_v0, %v241_v28  ;;  %v265_v42 = vmul.f32 %v427_v0, %v242_v33  ;;  %297 = vst [vmem:[%s691_s18 + $0x38] sm:$0xff] %v281_v35 }
  0x23   : > { %v284_v43 = vadd.f32 %v670_v2, %v261_v36  ;;  %v285_v44 = vadd.f32 %v670_v2, %v262_v37  ;;  %v286_v45 = vadd.f32 %v670_v2, %v263_v38  ;;  %v266_v46 = vmul.f32 %v427_v0, %v243_v34  ;;  %298 = vst [vmem:[%s691_s18 + $0x40] sm:$0xff] %v282_v39 }
  0x24   : > { %299 = vst [vmem:[%s691_s18 + $0x48] sm:$0xff] %v283_v40  ;;  %v287_v47 = vadd.f32 %v670_v2, %v264_v41  ;;  %v288_v48 = vadd.f32 %v670_v2, %v265_v42 }
  0x25   : > { %300 = vst [vmem:[%s691_s18 + $0x50] sm:$0xff] %v284_v43  ;;  %301 = vst [vmem:[%s691_s18 + $0x58] sm:$0xff] %v285_v44  ;;  %v289_v49 = vadd.f32 %v670_v2, %v266_v46 }
  0x26   : > { %302 = vst [vmem:[%s691_s18 + $0x60] sm:$0xff] %v286_v45  ;;  %303 = vst [vmem:[%s691_s18 + $0x68] sm:$0xff] %v287_v47 }
  0x27   : > { %304 = vst [vmem:[%s691_s18 + $0x70] sm:$0xff] %v288_v48  ;;  %305 = vst [vmem:[%s691_s18 + $0x78] sm:$0xff] %v289_v49 }
  0x28   : > { %506 = shalt.err (!%p503_p5)
}
  0x29   : > { %s507_s26 = scalar_lea.hbm %s720_s27, 2048  ;;  %s511_s8 = scalar_lea.hbm %s782_s3, 4096 }
  0x2a   : > { %p508_p6 = scmp.ne.s32.totalorder %s720_s27, %s507_s26  ;;  %p512_p10 = scmp.lt.u32.totalorder %s720_s27, %s782_s3 }
  0x2b   : > { %p513_p11 = scmp.lt.u32.totalorder %s511_s8, %s507_s26  ;;  %p515_p13 = scmp.lt.u32.totalorder %s507_s26, %s720_s27 }
  0x2c   : > { %p509_p7 = pnand %p508_p6, %p636_p4 }
  0x2d   : > { %p514_p12 = por %p513_p11, %p512_p10 }
  0x2e   : > { %p510_p9 = pneg %p509_p7 }
  0x2f   : > { %p516_p0 = por %p515_p13, %p514_p12 }
  0x31   : > { %p517_p1 = pnand %p516_p0, %p510_p9 }
  0x33   : > { %520 = shalt.err (!%p517_p1)
}
  0x34   : > { %s574_s11 = smov 128   ;;  %s575_s18 = smov 8  }
  0x35   : > { %436 = dma.vmem_to_hbm [thread:$0]  (%p636_p4), %s722_s21, 2048, %s720_s27, %s733_s28, %s574_s11, %s574_s11, %s575_s18  }
  0x36 PF: > { %p442_p2 = scmp.ge.s32.totalorder %s571_s17, 2  ;;  %s337_s19 = sand.u32 1, %s551_s12  }
  0x37   : > { %s338_s15 = scalar_lea.sflag [#allocation3], %s337_s19 }
  0x38   : > { %p439_p3 = pnand %p442_p2, %p643_p8 }
  0x3a   : > { %546 = dma.done.wait (!%p439_p3), %s338_s15, 2048  }
  0x3b   : > { %548 = vsyncadd (!%p439_p3), %s338_s15, 4294965248  ;;  %s16_s17 = sadd.s32 1, %s571_s17   ;;  %s785_s12 = smov %s555_s13 }
  0x3c   : > { %p13_p5 = scmp.ge.s32.totalorder %s16_s17, 4   ;;  %s786_s13 = smov %s559_s14 }
  0x3d   : > { %s787_s14 = smov %s649_s25  ;;  %s788_s15 = smov %s567_s16 }
  0x3e   : > { %s789_s16 = smov %s791_s20  ;;  %15 = sbr.rel (!%p13_p5) target bundleno = 4 (0x4), region = 73 }
  0x45   :  { %343 = vsyncpa [#allocation3], 1 }
  0x46   :  { %345 = vsyncpa [#allocation3 + $0x1], 1 }

// kernel: fused_linear_bn.2
= control target key start
LH: loop header
LB: loop body
LE: loop exit
PB: predicated region body
PF: predicated region fallthrough
CT: control target
= control target key end

     0   :  { %s800_s12 = smov 0   ;;  %s802_s13 = smov 0   ;;  %s878_s0 = inlined_call_operand.vmem [shape: bf16[2,128,32], index: 0, kind: input, shape index: {}]   ;;  %s879_s1 = inlined_call_operand.vmem [shape: bf16[2,32,128], index: 1, kind: input, shape index: {}]   ;;  %s880_s2 = inlined_call_operand.vmem [shape: f32[2,128,128], index: 2, kind: output, shape index: {0}]   ;;  %s881_s3 = inlined_call_operand.vmem [shape: f32[2,8,128], index: 3, kind: output, shape index: {1}]  }
   0x1   :  { %s804_s14 = smov 0  }
   0x2 LB: > { %s26_s15 = sadd.s32 1, %s773_s13  ;;  %p655_p0 = scmp.ge.s32.totalorder %s777_s14, 1  ;;  %s777_s14 = sphi %s804_s14, %s14_s14   ;;  %s773_s13 = sphi %s802_s13, %s883_s13   ;;  %s769_s12 = sphi %s800_s12, %s882_s12  }
   0x3   : > { %p28_p1 = scmp.ge.s32.totalorder %s26_s15, 2  ;;  %p171_p2 = scmp.lt.s32.totalorder %s777_s14, 3 }
   0x5   : > { %s885_s15 = smov (%p28_p1, %s26_s15), 0  ;;  %p172_p3 = pnand %p655_p0, %p171_p2 }
   0x6   : > { %p213_p4 = scmp.lt.s32.totalorder (!%p172_p3), %s769_s12, 1  ;;  %vm319_vm0 = vcmask (!%p172_p3), 261120   ;;  %v779_v10 = vmov (!%p172_p3), 0.0  }
   0x7   : > { %175 = sbr.rel (%p172_p3) target bundleno = 288 (0x120), region = 28 }
   0xe   : > { %s887_s12 = smov (!%p213_p4, %s769_s12), 1 }
   0xf   : > { %s683_s16 = sshll.u32 %s887_s12, 6  ;;  %s684_s17 = sshll.u32 %s887_s12, 4 }
  0x10   : > { %s220_s20 = scalar_lea.vmem %s878_s0, %s683_s16  ;;  %s226_s23 = scalar_lea.vmem %s879_s1, %s684_s17 }
  0x11   : > { %v745_v0 = vld [vmem:[%s226_s23] sm:$0xff]   ;;  %v746_v1 = vld [vmem:[%s226_s23 + $0x8] sm:$0xff]   ;;  %v749_v4 = vld [vmem:[%s220_s20 + $0x10] sm:$0xff]   ;;  %s662_s24 = sshll.u32 %s887_s12, 3  ;;  %s685_s28 = sshll.u32 %s887_s12, 7 }
  0x12   : > { %696 = vmatprep.subr.bf16.mxu0 %v745_v0  ;;  %v747_v2 = vld [vmem:[%s220_s20] sm:$0xff]   ;;  %716 = vmatprep.subr.bf16.mxu1 %v745_v0  ;;  %v748_v3 = vld [vmem:[%s220_s20 + $0x8] sm:$0xff]   ;;  %v753_v7 = vld [vmem:[%s220_s20 + $0x30] sm:$0xff]   ;;  %s840_s27 = scalar_lea.vmem %s881_s3, %s662_s24  ;;  %s847_s4 = scalar_lea.vmem %s880_s2, %s685_s28 }
  0x13   : > { %697 = vmatpush3.bf16.msra.mxu0 %v745_v0  ;;  %718 = vmatpush3.bf16.msra.mxu1 %v745_v0  ;;  %v751_v5 = vld [vmem:[%s220_s20 + $0x20] sm:$0xff]   ;;  %v752_v6 = vld [vmem:[%s220_s20 + $0x28] sm:$0xff]   ;;  %v750_v8 = vld [vmem:[%s220_s20 + $0x18] sm:$0xff]   ;;  %246 = vst [vmem:[%s840_s27] sm:$0xff] %v779_v10 }
  0x14   : > { %698 = vmatprep.subr.bf16.mxu0 %v746_v1  ;;  %700 = vmatprep.mubr.msk.bf16.mxu0 %vm319_vm0, %v747_v2  ;;  %v754_v9 = vld [vmem:[%s220_s20 + $0x38] sm:$0xff]  }
  0x15   : > { %717 = vmatprep.subr.bf16.mxu1 %v746_v1  ;;  %708 = vmatprep.mubr.msk.bf16.mxu1 %vm319_vm0, %v751_v5 }
  0x17   : > { %699 = vmatpush3.bf16.msra.mxu0 %v746_v1  ;;  %719 = vmatpush3.bf16.msra.mxu1 %v746_v1 }
  0x1a   : > { %701 = vmatmul.mubr.msk.bf16.vlgmr.msra.gmra.mrb[0].mxu0 %vm319_vm0, %v748_v3  ;;  %709 = vmatmul.mubr.msk.bf16.vlgmr.msra.gmra.mrb[0].mxu1 %vm319_vm0, %v752_v6 }
  0x1b   : > { %704 = vmatprep.mubr.msk.bf16.mxu0 %vm319_vm0, %v749_v4  ;;  %712 = vmatprep.mubr.msk.bf16.mxu1 %vm319_vm0, %v753_v7 }
  0x22   : > { %705 = vmatmul.mubr.msk.bf16.gmra.mrb[4].mxu0 %vm319_vm0, %v750_v8  ;;  %713 = vmatmul.mubr.msk.bf16.gmra.mrb[4].mxu1 %vm319_vm0, %v754_v9 }
  0xed   : > { %v702_v11 = vpop.f32.mrb[0].mxu0  ;;  %v710_v12 = vpop.f32.mrb[0].mxu1 }
  0xee   : > { %443 = vst [vmem:[%s847_s4 + $0x10] sm:$0xff] %v702_v11  ;;  %v378_v13 = vpop.f32.mrb[1].mxu0  ;;  %451 = vst [vmem:[%s847_s4 + $0x50] sm:$0xff] %v710_v12  ;;  %v410_v14 = vpop.f32.mrb[1].mxu1  ;;  %v484_v22 = vmul.f32 %v702_v11, %v702_v11  ;;  %v492_v54 = vmul.f32 %v710_v12, %v710_v12 }
  0xef   : > { %441 = vst [vmem:[%s847_s4] sm:$0xff] %v378_v13  ;;  %v703_v15 = vpop.f32.mrb[2].mxu0  ;;  %449 = vst [vmem:[%s847_s4 + $0x40] sm:$0xff] %v410_v14  ;;  %v711_v16 = vpop.f32.mrb[2].mxu1  ;;  %v482_v19 = vmul.f32 %v378_v13, %v378_v13  ;;  %v490_v48 = vmul.f32 %v410_v14, %v410_v14 }
  0xf0   : > { %444 = vst [vmem:[%s847_s4 + $0x18] sm:$0xff] %v703_v15  ;;  %v381_v17 = vpop.f32.mrb[3].mxu0  ;;  %452 = vst [vmem:[%s847_s4 + $0x58] sm:$0xff] %v711_v16  ;;  %v413_v18 = vpop.f32.mrb[3].mxu1  ;;  %v485_v25 = vmul.f32 %v703_v15, %v703_v15  ;;  %v493_v57 = vmul.f32 %v711_v16, %v711_v16 }
  0xf1   : > { %442 = vst [vmem:[%s847_s4 + $0x8] sm:$0xff] %v381_v17  ;;  %v458_v20 = vadd.f32 %v381_v17, %v378_v13  ;;  %v483_v21 = vmul.f32 %v381_v17, %v381_v17  ;;  %450 = vst [vmem:[%s847_s4 + $0x48] sm:$0xff] %v413_v18  ;;  %v491_v53 = vmul.f32 %v413_v18, %v413_v18 }
  0xf3   : > { %v459_v23 = vadd.f32 %v702_v11, %v458_v20  ;;  %v498_v24 = vadd.f32 %v483_v21, %v482_v19  ;;  %v481_v21 = vld [vmem:[%s840_s27 + $0x1] sm:$0x1] }
  0xf5   : > { %v499_v26 = vadd.f32 %v498_v24, %v484_v22  ;;  %v706_v27 = vpop.f32.mrb[4].mxu0  ;;  %v460_v28 = vadd.f32 %v703_v15, %v459_v23  ;;  %v714_v29 = vpop.f32.mrb[4].mxu1 }
  0xf6   : > { %447 = vst [vmem:[%s847_s4 + $0x30] sm:$0xff] %v706_v27  ;;  %v394_v30 = vpop.f32.mrb[5].mxu0  ;;  %455 = vst [vmem:[%s847_s4 + $0x70] sm:$0xff] %v714_v29  ;;  %v426_v31 = vpop.f32.mrb[5].mxu1  ;;  %v488_v42 = vmul.f32 %v706_v27, %v706_v27  ;;  %v496_v2 = vmul.f32 %v714_v29, %v714_v29 }
  0xf7   : > { %445 = vst [vmem:[%s847_s4 + $0x20] sm:$0xff] %v394_v30  ;;  %v461_v32 = vadd.f32 %v460_v28, %v394_v30  ;;  %v486_v33 = vmul.f32 %v394_v30, %v394_v30  ;;  %v500_v34 = vadd.f32 %v499_v26, %v485_v25  ;;  %v707_v35 = vpop.f32.mrb[6].mxu0  ;;  %453 = vst [vmem:[%s847_s4 + $0x60] sm:$0xff] %v426_v31  ;;  %v715_v36 = vpop.f32.mrb[6].mxu1 }
  0xf8   : > { %448 = vst [vmem:[%s847_s4 + $0x38] sm:$0xff] %v707_v35  ;;  %v397_v37 = vpop.f32.mrb[7].mxu0  ;;  %456 = vst [vmem:[%s847_s4 + $0x78] sm:$0xff] %v715_v36  ;;  %v429_v38 = vpop.f32.mrb[7].mxu1  ;;  %v489_v45 = vmul.f32 %v707_v35, %v707_v35  ;;  %v494_v60 = vmul.f32 %v426_v31, %v426_v31  ;;  %v497_v5 = vmul.f32 %v715_v36, %v715_v36 }
  0xf9   : > { %v501_v39 = vadd.f32 %v500_v34, %v486_v33  ;;  %446 = vst [vmem:[%s847_s4 + $0x28] sm:$0xff] %v397_v37  ;;  %v462_v40 = vadd.f32 %v461_v32, %v397_v37  ;;  %v487_v41 = vmul.f32 %v397_v37, %v397_v37  ;;  %454 = vst [vmem:[%s847_s4 + $0x68] sm:$0xff] %v429_v38 }
  0xfa   : > { %v495_v1 = vmul.f32 %v429_v38, %v429_v38 }
  0xfb   : > { %v463_v43 = vadd.f32 %v706_v27, %v462_v40  ;;  %v502_v44 = vadd.f32 %v501_v39, %v487_v41 }
  0xfd   : > { %v503_v46 = vadd.f32 %v502_v44, %v488_v42  ;;  %v464_v47 = vadd.f32 %v707_v35, %v463_v43 }
  0xff   : > { %v465_v49 = vadd.f32 %v464_v47, %v410_v14  ;;  %v504_v50 = vadd.f32 %v503_v46, %v489_v45 }
 0x101   : > { %v505_v51 = vadd.f32 %v504_v50, %v490_v48  ;;  %v466_v52 = vadd.f32 %v465_v49, %v413_v18  ;;  %v457_v18 = vld [vmem:[%s840_s27] sm:$0x1] }
 0x103   : > { %v467_v55 = vadd.f32 %v710_v12, %v466_v52  ;;  %v506_v56 = vadd.f32 %v505_v51, %v491_v53 }
 0x105   : > { %v507_v58 = vadd.f32 %v506_v56, %v492_v54  ;;  %v468_v59 = vadd.f32 %v711_v16, %v467_v55 }
 0x107   : > { %v469_v61 = vadd.f32 %v468_v59, %v426_v31  ;;  %v508_v62 = vadd.f32 %v507_v58, %v493_v57 }
 0x109   : > { %v509_v63 = vadd.f32 %v508_v62, %v494_v60  ;;  %v470_v0 = vadd.f32 %v469_v61, %v429_v38 }
 0x10b   : > { %v471_v3 = vadd.f32 %v714_v29, %v470_v0  ;;  %v510_v4 = vadd.f32 %v509_v63, %v495_v1 }
 0x10d   : > { %v472_v6 = vadd.f32 %v715_v36, %v471_v3  ;;  %v511_v7 = vadd.f32 %v510_v4, %v496_v2 }
 0x10f   : > { %v473_v8 = vrot.slane %v472_v6, 4  ;;  %v512_v9 = vadd.f32 %v511_v7, %v497_v5 }
 0x111   : > { %v474_v10 = vadd.f32 %v473_v8, %v472_v6  ;;  %v513_v11 = vrot.slane %v512_v9, 4 }
 0x113   : > { %v475_v12 = vrot.slane %v474_v10, 2  ;;  %v514_v13 = vadd.f32 %v513_v11, %v512_v9 }
 0x115   : > { %v476_v14 = vadd.f32 %v475_v12, %v474_v10  ;;  %v515_v15 = vrot.slane %v514_v13, 2 }
 0x117   : > { %v477_v16 = vrot.slane %v476_v14, 1  ;;  %v516_v17 = vadd.f32 %v515_v15, %v514_v13 }
 0x119   : > { %v478_v19 = vadd.f32 %v477_v16, %v476_v14  ;;  %v517_v20 = vrot.slane %v516_v17, 1 }
 0x11b   : > { %v479_v22 = vadd.f32 %v478_v19, %v457_v18  ;;  %v518_v23 = vadd.f32 %v517_v20, %v516_v17 }
 0x11d   : > { %480 = vst [vmem:[%s840_s27] sm:$0x1] %v479_v22  ;;  %v519_v24 = vadd.f32 %v518_v23, %v481_v21 }
 0x11f   : > { %520 = vst [vmem:[%s840_s27 + $0x1] sm:$0x1] %v519_v24 }
 0x120 PF: > { %s14_s14 = sadd.s32 1, %s777_s14   ;;  %s882_s12 = smov %s773_s13 }
 0x121   : > { %p11_p5 = scmp.ge.s32.totalorder %s14_s14, 4   ;;  %s883_s13 = smov %s885_s15 }
 0x123   :  { %13 = sbr.rel (!%p11_p5) target bundleno = 2 (0x2), region = 77 }

</bundles_post_ra>
